<compile_context>
chip_gen: v7x
topology: tpu7x:2x2x1
jax: 0.10.0
libtpu: 0.0.40
codegen_flags: <defaults>
</compile_context>

<pallas_src>
import functools

import jax
import jax.numpy as jnp
from jax.experimental import pallas as pl
from jax.experimental.pallas import tpu as pltpu


def _velocity_kernel(t_ref,          # scalar-prefetch: [B] timesteps in SMEM
                     x_ref,          # [C, T_HW]   (NCHW-native, batch squeezed)
                     w1_ref,         # [Hid, C]    W1^T  bf16 (resident)
                     b1_ref,         # [Hid, 1]    f32
                     wt_ref,         # [Hid, 1]    f32
                     w2_ref,         # [C, Hid]    W2^T  bf16 (resident)
                     b2_ref,         # [C, 1]      f32
                     o_ref,          # [C, T_HW]
                     *, act_dtype):
    b = pl.program_id(0)
    t = t_ref[b]                     # scalar timestep for this batch element

    # Fold the time conditioning into a single [Hid, 1] bias (one VPU op),
    # broadcast along the 128-lane HW axis by the add below.
    bias = b1_ref[...] + t * wt_ref[...]

    # dot1: [Hid, C] @ [C, T_HW] -> [Hid, T_HW]; bf16 operands, f32 accum.
    x = x_ref[...].astype(w1_ref.dtype)
    h = jnp.dot(w1_ref[...], x, preferred_element_type=jnp.float32) + bias

    # Sigmoid-GELU (cheap VALU + one EUP push); bf16 on v6e/v7x, f32 on v5e.
    # TODO(synk): PyTorch nn.GELU defaults to exact erf; a sigmoid-GELU
    # approximation is used here (the inner module is synthetic anyway).
    a = h.astype(act_dtype)
    a = a * jax.nn.sigmoid(1.702 * a)

    # dot2: [C, Hid] @ [Hid, T_HW] -> [C, T_HW]; lane-dense, maps to NCHW.
    out = jnp.dot(w2_ref[...], a.astype(w2_ref.dtype),
                  preferred_element_type=jnp.float32) + b2_ref[...]
    o_ref[...] = out.astype(o_ref.dtype)


def _act_dtype_for_device():
    """bf16 activation path on v6e/v7x (native bf16 VPU/EUP); f32 otherwise."""
    try:
        kind = jax.devices()[0].device_kind.lower()
    except Exception:
        return jnp.float32
    if "v6" in kind or "v7" in kind:
        return jnp.bfloat16
    return jnp.float32


def _pick_hw_tile(hw_pad, batch, max_tile=32768):
    """Largest multiple-of-128 divisor of hw_pad that is <= max_tile, keeping
    at least two grid steps when batch == 1 (feeds both v7x TensorCores)."""
    min_blocks = 2 if (batch == 1 and hw_pad >= 256) else 1
    best = 128
    tile = 128
    limit = min(max_tile, hw_pad)
    while tile <= limit:
        if hw_pad % tile == 0 and hw_pad // tile >= min_blocks:
            best = tile
        tile += 128
    return best


def consistency_fm_forward(x_nchw, t, params, act_dtype=None):
    """Forward pass of ConsistencyFlowMatching (== velocity_estim(x_t, t)).

    Args:
        x_nchw: [B, C, H, W] float32 noised sample x_t.
        t:      [B] float32 timesteps in [0, 1].
        params: dict of weights (w1 [C,Hid], b1 [1,Hid], wt [1,Hid],
                w2 [Hid,C], b2 [1,C]).
        act_dtype: activation compute dtype (auto-selected per device if None).
    Returns:
        [B, C, H, W] estimated velocity.
    """
    if act_dtype is None:
        act_dtype = _act_dtype_for_device()
    mm_dtype = jnp.bfloat16                     # single-pass MXU operands

    B, C, H, W = x_nchw.shape
    HW = H * W
    hidden = params["w1"].shape[1]

    # NCHW -> [B, C, HW]: pure reshape; pad HW to a multiple of 128 so all
    # loads/stores are lane-dense (no masked vst) and any tile divides evenly.
    x = x_nchw.reshape(B, C, HW)
    HW_pad = ((HW + 127) // 128) * 128
    if HW_pad != HW:
        x = jnp.pad(x, ((0, 0), (0, 0), (0, HW_pad - HW)))

    # Transposed weight layout so both MXU matmuls keep HW on the lane axis.
    w1t = params["w1"].T.astype(mm_dtype)                   # [Hid, C]
    b1t = params["b1"].reshape(hidden, 1).astype(jnp.float32)
    wtt = params["wt"].reshape(hidden, 1).astype(jnp.float32)
    w2t = params["w2"].T.astype(mm_dtype)                   # [C, Hid]
    b2t = params["b2"].reshape(C, 1).astype(jnp.float32)

    t_hw = _pick_hw_tile(HW_pad, B)
    n_hw = HW_pad // t_hw

    grid_spec = pltpu.PrefetchScalarGridSpec(
        num_scalar_prefetch=1,                  # t lands in SMEM
        grid=(B, n_hw),
        in_specs=[
            pl.BlockSpec((None, C, t_hw), lambda b, j, t_ref: (b, 0, j)),   # x
            pl.BlockSpec((hidden, C),     lambda b, j, t_ref: (0, 0)),      # W1^T
            pl.BlockSpec((hidden, 1),     lambda b, j, t_ref: (0, 0)),      # b1^T
            pl.BlockSpec((hidden, 1),     lambda b, j, t_ref: (0, 0)),      # wt^T
            pl.BlockSpec((C, hidden),     lambda b, j, t_ref: (0, 0)),      # W2^T
            pl.BlockSpec((C, 1),          lambda b, j, t_ref: (0, 0)),      # b2^T
        ],
        out_specs=pl.BlockSpec((None, C, t_hw), lambda b, j, t_ref: (b, 0, j)),
    )

    itemsize = jnp.dtype(x_nchw.dtype).itemsize
    weight_bytes = sum(int(w.size) * jnp.dtype(w.dtype).itemsize
                       for w in (w1t, b1t, wtt, w2t, b2t))
    cost = pl.CostEstimate(
        flops=4 * B * HW_pad * C * hidden,          # two matmuls, 2*M*N*K each
        transcendentals=B * HW_pad * hidden,        # one sigmoid per hidden elem
        bytes_accessed=2 * B * C * HW_pad * itemsize + weight_bytes + B * 4,
    )

    out = pl.pallas_call(
        functools.partial(_velocity_kernel, act_dtype=act_dtype),
        out_shape=jax.ShapeDtypeStruct((B, C, HW_pad), x_nchw.dtype),
        grid_spec=grid_spec,
        compiler_params=pltpu.CompilerParams(
            dimension_semantics=("parallel", "parallel"),
            vmem_limit_bytes=48 * 1024 * 1024),     # fits larger tiles on all gens
        cost_estimate=cost,
    )(t.astype(jnp.float32), x, w1t, b1t, wtt, w2t, b2t)

    if HW_pad != HW:
        out = out[:, :, :HW]
    # [B, C, HW] -> NCHW: free reshape, no transpose.
    return out.reshape(B, C, H, W)


def _reference_forward(x_nchw, t, params, act_dtype=jnp.float32,
                       mm_dtype=jnp.bfloat16):
    """Pure-JAX reference mirroring the kernel's dtype choices exactly."""
    B, C, H, W = x_nchw.shape
    x = x_nchw.reshape(B, C, H * W).astype(mm_dtype)                 # [B, C, HW]
    h = jnp.einsum("hc,bcp->bhp", params["w1"].T.astype(mm_dtype), x,
                   preferred_element_type=jnp.float32)               # [B, Hid, HW]
    h = h + params["b1"].T[None] + t[:, None, None] * params["wt"].T[None]
    a = h.astype(act_dtype)
    a = (a * jax.nn.sigmoid(1.702 * a)).astype(mm_dtype)
    out = jnp.einsum("ch,bhp->bcp", params["w2"].T.astype(mm_dtype), a,
                     preferred_element_type=jnp.float32)
    out = out + params["b2"].T[None]
    return out.reshape(B, C, H, W).astype(x_nchw.dtype)


def init_params(C, hidden, key):
    """Deterministic synthetic weight init (no checkpoint load)."""
    k1, k2, k3, k4, k5 = jax.random.split(key, 5)
    scale1 = 1.0 / jnp.sqrt(jnp.float32(C))
    scale2 = 1.0 / jnp.sqrt(jnp.float32(hidden))
    return {
        "w1": jax.random.normal(k1, (C, hidden), jnp.float32) * scale1,
        "b1": jax.random.normal(k2, (1, hidden), jnp.float32) * 0.01,
        "wt": jax.random.normal(k3, (1, hidden), jnp.float32) * 0.1,
        "w2": jax.random.normal(k4, (hidden, C), jnp.float32) * scale2,
        "b2": jax.random.normal(k5, (1, C), jnp.float32) * 0.01,
    }


if __name__ == "__main__":
    key = jax.random.PRNGKey(0)
    kx, kt, kw, kx2, kt2 = jax.random.split(key, 5)

    act_dtype = _act_dtype_for_device()
    tol = 1e-3 if act_dtype == jnp.float32 else 3e-2

    # Case 1: canonical small shape (B=2, C=4, H=W=16, hidden=32): single tile.
    B, C, H, W, hidden = 2, 4, 16, 16, 32
    params = init_params(C, hidden, kw)
    x_t = jax.random.normal(kx, (B, C, H, W), jnp.float32)   # noised sample x_t
    t = jax.random.uniform(kt, (B,), jnp.float32)            # timesteps in [0, 1]

    out = jax.block_until_ready(
        consistency_fm_forward(x_t, t, params, act_dtype=act_dtype))
    ref = _reference_forward(x_t, t, params, act_dtype=act_dtype)
    assert out.shape == (B, C, H, W)
    assert jnp.allclose(out, ref, atol=tol, rtol=tol), "case1 mismatch vs reference"

    # Case 2: B=1 (forces >= 2 grid steps), HW=400 not a multiple of 128
    # (exercises padding) -> padded to 512 = two 256-lane tiles (n_hw > 1).
    B2, H2, W2 = 1, 20, 20
    x_t2 = jax.random.normal(kx2, (B2, C, H2, W2), jnp.float32)
    t2 = jax.random.uniform(kt2, (B2,), jnp.float32)
    out2 = jax.block_until_ready(
        consistency_fm_forward(x_t2, t2, params, act_dtype=act_dtype))
    ref2 = _reference_forward(x_t2, t2, params, act_dtype=act_dtype)
    assert out2.shape == (B2, C, H2, W2)
    assert jnp.allclose(out2, ref2, atol=tol, rtol=tol), "case2 mismatch vs reference"

    # TODO(synk): `loss`/`sample` (training objective & Euler solver) are not part
    # of forward(); only the velocity-estimation forward pass is kernelized.
    print("KERNEL_OK")
</pallas_src>

<mosaic_0001>
module attributes {stable_mosaic.version = 11 : i64} {
  func.func @_velocity_kernel(%arg0: i32, %arg1: i32, %arg2: memref<2xf32, #tpu.memory_space<smem>>, %arg3: memref<1x4x256xf32, #tpu.memory_space<vmem>>, %arg4: memref<32x4xbf16, #tpu.memory_space<vmem>>, %arg5: memref<32x1xf32, #tpu.memory_space<vmem>>, %arg6: memref<32x1xf32, #tpu.memory_space<vmem>>, %arg7: memref<4x32xbf16, #tpu.memory_space<vmem>>, %arg8: memref<4x1xf32, #tpu.memory_space<vmem>>, %arg9: memref<1x4x256xf32, #tpu.memory_space<vmem>>) attributes {dimension_semantics = [#tpu.dimension_semantics<parallel>, #tpu.dimension_semantics<parallel>], iteration_bounds = array<i64: 2, 1>, scalar_prefetch = 1 : i64, scratch_operands = 0 : i64, tpu.core_type = #tpu.core_type<tc>, window_params = [{transform_indices = @transform_0, window_bounds = array<i64: 1, 4, 256>}, {pipeline_mode = #tpu.pipeline_mode<synchronous>, transform_indices = @transform_1, window_bounds = array<i64: 32, 4>}, {pipeline_mode = #tpu.pipeline_mode<synchronous>, transform_indices = @transform_2, window_bounds = array<i64: 32, 1>}, {pipeline_mode = #tpu.pipeline_mode<synchronous>, transform_indices = @transform_3, window_bounds = array<i64: 32, 1>}, {pipeline_mode = #tpu.pipeline_mode<synchronous>, transform_indices = @transform_4, window_bounds = array<i64: 4, 32>}, {pipeline_mode = #tpu.pipeline_mode<synchronous>, transform_indices = @transform_5, window_bounds = array<i64: 4, 1>}, {transform_indices = @transform_6, window_bounds = array<i64: 1, 4, 256>}]} {
    %0 = arith.index_cast %arg0 : i32 to index
    %1 = memref.load %arg2[%0] : memref<2xf32, #tpu.memory_space<smem>>
    %c0 = arith.constant 0 : index
    %c0_0 = arith.constant 0 : index
    %2 = vector.load %arg5[%c0, %c0_0] : memref<32x1xf32, #tpu.memory_space<vmem>>, vector<32x1xf32>
    %c0_1 = arith.constant 0 : index
    %c0_2 = arith.constant 0 : index
    %3 = vector.load %arg6[%c0_1, %c0_2] : memref<32x1xf32, #tpu.memory_space<vmem>>, vector<32x1xf32>
    %4 = vector.broadcast %1 : f32 to vector<32x1xf32>
    %5 = arith.mulf %4, %3 : vector<32x1xf32>
    %6 = arith.addf %2, %5 : vector<32x1xf32>
    %c0_3 = arith.constant 0 : index
    %c0_4 = arith.constant 0 : index
    %c0_5 = arith.constant 0 : index
    %7 = vector.load %arg3[%c0_3, %c0_4, %c0_5] : memref<1x4x256xf32, #tpu.memory_space<vmem>>, vector<1x4x256xf32>
    %8 = vector.shape_cast %7 : vector<1x4x256xf32> to vector<4x256xf32>
    %9 = arith.truncf %8 : vector<4x256xf32> to vector<4x256xbf16>
    %c0_6 = arith.constant 0 : index
    %c0_7 = arith.constant 0 : index
    %10 = vector.load %arg4[%c0_6, %c0_7] : memref<32x4xbf16, #tpu.memory_space<vmem>>, vector<32x4xbf16>
    %cst = arith.constant dense<0.000000e+00> : vector<32x256xf32>
    %11 = tpu.matmul %10, %9, %cst {dimension_numbers = #tpu.dot_dimension_numbers<[1], [0], [0], [1], [0, 0, 1, 1], [], []>} : vector<32x4xbf16>, vector<4x256xbf16>, vector<32x256xf32> -> vector<32x256xf32>
    %12 = vector.broadcast %6 : vector<32x1xf32> to vector<32x256xf32>
    %13 = arith.addf %11, %12 : vector<32x256xf32>
    %cst_8 = arith.constant 1.702000e+00 : f32
    %14 = vector.broadcast %cst_8 : f32 to vector<32x256xf32>
    %15 = arith.mulf %14, %13 : vector<32x256xf32>
    %16 = arith.negf %15 : vector<32x256xf32>
    %17 = math.exp %16 : vector<32x256xf32>
    %cst_9 = arith.constant 1.000000e+00 : f32
    %18 = vector.broadcast %cst_9 : f32 to vector<32x256xf32>
    %19 = arith.addf %18, %17 : vector<32x256xf32>
    %20 = arith.divf %18, %19 : vector<32x256xf32>
    %21 = arith.mulf %13, %20 : vector<32x256xf32>
    %c0_10 = arith.constant 0 : index
    %c0_11 = arith.constant 0 : index
    %22 = vector.load %arg7[%c0_10, %c0_11] : memref<4x32xbf16, #tpu.memory_space<vmem>>, vector<4x32xbf16>
    %23 = arith.truncf %21 : vector<32x256xf32> to vector<32x256xbf16>
    %cst_12 = arith.constant dense<0.000000e+00> : vector<4x256xf32>
    %24 = tpu.matmul %22, %23, %cst_12 {dimension_numbers = #tpu.dot_dimension_numbers<[1], [0], [0], [1], [0, 0, 1, 1], [], []>} : vector<4x32xbf16>, vector<32x256xbf16>, vector<4x256xf32> -> vector<4x256xf32>
    %c0_13 = arith.constant 0 : index
    %c0_14 = arith.constant 0 : index
    %25 = vector.load %arg8[%c0_13, %c0_14] : memref<4x1xf32, #tpu.memory_space<vmem>>, vector<4x1xf32>
    %26 = vector.broadcast %25 : vector<4x1xf32> to vector<4x256xf32>
    %27 = arith.addf %24, %26 : vector<4x256xf32>
    %c0_15 = arith.constant 0 : index
    %c0_16 = arith.constant 0 : index
    %c0_17 = arith.constant 0 : index
    %28 = vector.load %arg9[%c0_15, %c0_16, %c0_17] : memref<1x4x256xf32, #tpu.memory_space<vmem>>, vector<1x4x256xf32>
    %29 = vector.shape_cast %28 : vector<1x4x256xf32> to vector<4x256xf32>
    %30 = vector.shape_cast %27 : vector<4x256xf32> to vector<1x4x256xf32>
    tpu.vector_store %arg9[%c0_15, %c0_16, %c0_17], %30 {strides = array<i32>} : memref<1x4x256xf32, #tpu.memory_space<vmem>>, vector<1x4x256xf32>,
    return
  }
  func.func @transform_0(%arg0: i32, %arg1: i32, %arg2: memref<2xf32, #tpu.memory_space<smem>>) -> (i32, i32, i32) {
    %c0_i32 = arith.constant 0 : i32
    %c0_i32_0 = arith.constant 0 : i32
    return %arg0, %c0_i32, %arg1 : i32, i32, i32
  }
  func.func @transform_1(%arg0: i32, %arg1: i32, %arg2: memref<2xf32, #tpu.memory_space<smem>>) -> (i32, i32) {
    %c0_i32 = arith.constant 0 : i32
    %c0_i32_0 = arith.constant 0 : i32
    %c0_i32_1 = arith.constant 0 : i32
    return %c0_i32, %c0_i32_0 : i32, i32
  }
  func.func @transform_2(%arg0: i32, %arg1: i32, %arg2: memref<2xf32, #tpu.memory_space<smem>>) -> (i32, i32) {
    %c0_i32 = arith.constant 0 : i32
    %c0_i32_0 = arith.constant 0 : i32
    %c0_i32_1 = arith.constant 0 : i32
    return %c0_i32, %c0_i32_0 : i32, i32
  }
  func.func @transform_3(%arg0: i32, %arg1: i32, %arg2: memref<2xf32, #tpu.memory_space<smem>>) -> (i32, i32) {
    %c0_i32 = arith.constant 0 : i32
    %c0_i32_0 = arith.constant 0 : i32
    %c0_i32_1 = arith.constant 0 : i32
    return %c0_i32, %c0_i32_0 : i32, i32
  }
  func.func @transform_4(%arg0: i32, %arg1: i32, %arg2: memref<2xf32, #tpu.memory_space<smem>>) -> (i32, i32) {
    %c0_i32 = arith.constant 0 : i32
    %c0_i32_0 = arith.constant 0 : i32
    %c0_i32_1 = arith.constant 0 : i32
    return %c0_i32, %c0_i32_0 : i32, i32
  }
  func.func @transform_5(%arg0: i32, %arg1: i32, %arg2: memref<2xf32, #tpu.memory_space<smem>>) -> (i32, i32) {
    %c0_i32 = arith.constant 0 : i32
    %c0_i32_0 = arith.constant 0 : i32
    %c0_i32_1 = arith.constant 0 : i32
    return %c0_i32, %c0_i32_0 : i32, i32
  }
  func.func @transform_6(%arg0: i32, %arg1: i32, %arg2: memref<2xf32, #tpu.memory_space<smem>>) -> (i32, i32, i32) {
    %c0_i32 = arith.constant 0 : i32
    %c0_i32_0 = arith.constant 0 : i32
    return %arg0, %c0_i32, %arg1 : i32, i32, i32
  }
}

</mosaic_0001>

<bundles_post_ra>
// kernel: tpu_custom_call.1
= control target key start
LH: loop header
LB: loop body
LE: loop exit
PB: predicated region body
PF: predicated region fallthrough
CT: control target
= control target key end

     0   :  { %s1062_s0 = inlined_call_operand.vmem [shape: f32[2], index: 0, kind: input, shape index: {}]   ;;  %s1063_s1 = inlined_call_operand.vmem [shape: f32[2,4,256], index: 1, kind: input, shape index: {}]   ;;  %s1064_s2 = inlined_call_operand.vmem [shape: bf16[32,4], index: 2, kind: input, shape index: {}]   ;;  %s1065_s3 = inlined_call_operand.vmem [shape: f32[32,1], index: 3, kind: input, shape index: {}]   ;;  %s1066_s4 = inlined_call_operand.vmem [shape: f32[32,1], index: 4, kind: input, shape index: {}]   ;;  %s1067_s5 = inlined_call_operand.vmem [shape: bf16[4,32], index: 5, kind: input, shape index: {}]   ;;  %s1068_s6 = inlined_call_operand.vmem [shape: f32[4,1], index: 6, kind: input, shape index: {}]   ;;  %s1069_s7 = inlined_call_operand.hbm [shape: f32[2,4,256], index: 7, kind: output, shape index: {}]  }
   0x1   :  { %s12_s26 = sshll.u32 %s1062_s0, 4  ;;  %s13_s26 = int_to_ptr.vmem [resolvable:$true] %s12_s26 }
   0x2   :  { %s755_s27 = scalar_lea.vmem %s13_s26, 16  ;;  %p760_p1 = scmp.lt.s32.totalorder %s13_s26, %s13_s26 }
   0x3   :  { %p756_p0 = scmp.ne.s32.totalorder %s13_s26, %s755_s27  ;;  %p761_p2 = scmp.lt.s32.totalorder %s755_s27, %s755_s27 }
   0x5   :  { %p762_p3 = por %p761_p2, %p760_p1 }
   0x7   :  { %p763_p4 = pnand %p762_p3, %p756_p0 }
   0x9   :  { %766 = shalt.err (!%p763_p4)  }
   0xa   :  { %s849_s28 = smov [#allocation3]  }
   0xb   :  { %15 = dma.vmem_to_smem %s13_s26, 16, %s849_s28, [#allocation2] }
   0xc   :  { %819 = dma.done.wait [#allocation2], 16 }
   0xd   :  { %820 = vsyncadd [#allocation2], 4294967280 }
   0xe   :  { %17 = sfence }
   0xf   :  { %18 = vsyncpa [#allocation5], 0 }
  0x10   :  { %20 = vsyncpa [#allocation5 + $0x1], 0  ;;  %s895_s29 = smov 0   ;;  %s897_s30 = smov 0  }
  0x11   :  { %s899_s0 = smov 0   ;;  %s901_s8 = smov 0  }
  0x12   :  { %s903_s9 = smov 0   ;;  %s905_s10 = smov 0  }
  0x13 LB: > { %s632_s11 = sadd.s32 4294967295, %s847_s10   ;;  %s633_s12 = sadd.s32 4294967294, %s847_s10   ;;  %s847_s10 = sphi %s905_s10, %s26_s10   ;;  %s843_s9 = sphi %s903_s9, %s1076_s9   ;;  %s839_s8 = sphi %s901_s8, %s1075_s8   ;;  %s835_s0 = sphi %s899_s0, %s1074_s0   ;;  %s831_s30 = sphi %s897_s30, %s1073_s30   ;;  %s827_s29 = sphi %s895_s29, %s1072_s29  }
  0x14   : > { %s38_s13 = sadd.s32 1, %s843_s9  ;;  %s180_s14 = sadd.s32 1, %s835_s0 }
  0x15   : > { %p40_p5 = scmp.ge.s32.totalorder %s38_s13, 2  ;;  %p190_p6 = scmp.ne.s32.totalorder %s835_s0, %s831_s30 }
  0x16   : > { %p191_p7 = scmp.eq.s32.totalorder %s632_s11, 1  ;;  %p196_p8 = scmp.ne.s32.totalorder %s831_s30, %s827_s29 }
  0x17   : > { %s1078_s13 = smov (%p40_p5, %s38_s13), 0  ;;  %p197_p10 = scmp.eq.s32.totalorder %s633_s12, 1 }
  0x18   : > { %p935_p9 = por %p191_p7, %p190_p6  ;;  %s175_s16 = ssub.s32 %s843_s9, %s1078_s13 }
  0x19   : > { %p636_p11 = scmp.ge.s32.totalorder %s847_s10, 1  ;;  %p178_p12 = scmp.eq.s32.totalorder %s175_s16, 0 }
  0x1a   : > { %p942_p13 = por %p197_p10, %p196_p8  ;;  %p243_p0 = scmp.lt.s32.totalorder %s847_s10, 3 }
  0x1b   : > { %s948_s18 = scalar_select %p178_p12, %s835_s0, %s180_s14  }
  0x1c   : > { %p244_p1 = pnand %p636_p11, %p243_p0 }
  0x1d   : > { %p278_p2 = scmp.lt.s32.totalorder (!%p244_p1), %s839_s8, 1  ;;  %v850_v0 = vmov (!%p244_p1), 0   ;;  %s289_s20 = sld [smem:[#allocation3 + %s839_s8]] (!%p244_p1)  ;;  %vm354_vm0 = vcmask (!%p244_p1), 1041408   ;;  %v294_v2 = vld [vmem:[%s1066_s4] sm:$0xff] (!%p244_p1)  ;;  %v295_v5 = vld [vmem:[%s1066_s4 + $0x8] sm:$0xff] (!%p244_p1) }
  0x1e   : > { %247 = sbr.rel (%p244_p1) target bundleno = 542 (0x21e), region = 44  ;;  %393 = vmatprep.mubr.bf16.mxu0 (!%p244_p1), %v850_v0  ;;  %718 = vset.pattern.permute.xlu0 (!%p244_p1), %v850_v0  ;;  %v296_v6 = vld [vmem:[%s1066_s4 + $0x10] sm:$0xff] (!%p244_p1)  ;;  %v297_v7 = vld [vmem:[%s1066_s4 + $0x18] sm:$0xff] (!%p244_p1)  ;;  %v290_v10 = vld [vmem:[%s1065_s3] sm:$0xff] (!%p244_p1)  ;;  %vm347_vm1 = vcmask (!%p244_p1), 31744   ;;  %vm489_vm2 = vcmask (!%p244_p1), 261120  }
  0x1f   : > { %719 = vset.pattern.permute.xlu1 (!%p244_p1), %v850_v0  ;;  %525 = vmatprep.mubr.bf16.mxu1 (!%p244_p1), %v850_v0  ;;  %v292_v12 = vld [vmem:[%s1065_s3 + $0x10] sm:$0xff] (!%p244_p1)  ;;  %v721_v17 = vld [vmem:[%s1064_s2] sm:$0xff] (!%p244_p1)   ;;  %v291_v18 = vld [vmem:[%s1065_s3 + $0x8] sm:$0xff] (!%p244_p1)  ;;  %s274_s22 = sand.u32 (!%p244_p1), 1, %s831_s30  }
  0x20   : > { %v293_v19 = vld [vmem:[%s1065_s3 + $0x18] sm:$0xff] (!%p244_p1)  ;;  %v722_v24 = vld [vmem:[%s1064_s2 + $0x8] sm:$0xff] (!%p244_p1)   ;;  %v483_v25 = vld [vmem:[%s1068_s6] sm:$0xf] (!%p244_p1)  ;;  %s637_s23 = sshll.u32 (!%p244_p1), %s274_s22, 3  ;;  %s540_s11 = scalar_lea.sflag (!%p244_p1), [#allocation5], %s274_s22 }
  0x21   : > { %s276_s25 = scalar_lea.vmem (!%p244_p1), [#allocation4], %s637_s23 }
  0x22   : > { %s556_s26 = sshll.u32 (!%p244_p1), %s276_s25, 4  ;;  %s1017_s26 = int_to_ptr.vmem [resolvable:$true] %s556_s26 }
  0x23   : > { %v298_v11 = vstv (!%p244_p1), %s289_s20  ;;  %s767_s12 = scalar_lea.vmem (!%p244_p1), %s1017_s26, 128 }
  0x24   : > { %v299_v13 = vmul.f32 (!%p244_p1), %v298_v11, %v294_v2  ;;  %v300_v14 = vmul.f32 (!%p244_p1), %v298_v11, %v295_v5  ;;  %v301_v15 = vmul.f32 (!%p244_p1), %v298_v11, %v296_v6  ;;  %v302_v16 = vmul.f32 (!%p244_p1), %v298_v11, %v297_v7  ;;  %p768_p3 = scmp.ne.s32.totalorder (!%p244_p1), %s1017_s26, %s767_s12 }
  0x25   : > { %s279_s19 = scalar_select %p278_p2, %s839_s8, 1 }
  0x26   : > { %v303_v20 = vadd.f32 %v299_v13, %v290_v10  ;;  %v305_v21 = vadd.f32 %v301_v15, %v292_v12  ;;  %v304_v22 = vadd.f32 %v300_v14, %v291_v18  ;;  %v306_v23 = vadd.f32 %v302_v16, %v293_v19  ;;  %p769_p4 = pnand %p768_p3, %p935_p9 }
  0x27   : > { %s659_s21 = sshll.u32 %s279_s19, 3 }
  0x28   : > { %s285_s24 = scalar_lea.vmem %s1063_s1, %s659_s21  ;;  %319 = vperm.xlu0 %718, %v303_v20   ;;  %329 = vperm.xlu1 %719, %v305_v21   ;;  %p770_p5 = pneg %p769_p4 }
  0x29   : > { %v307_v1 = vld [vmem:[%s285_s24] sm:$0xff]  ;;  %s660_s24 = sshll.u32 %s839_s8, 7  ;;  %s851_s8 = smov [#allocation4]  }
  0x2a   : > { %v309_v3 = vcombine.high %v307_v1, %v307_v1  ;;  %v311_v4 = vpack.c.bf16 %v307_v1, %v307_v1  ;;  %s1015_s20 = scalar_lea.hbm %s1069_s7, %s660_s24  ;;  %s771_s14 = sshll.u32 %s851_s8, 4  ;;  %s772_s14 = int_to_ptr.vmem [resolvable:$false] %s771_s14 }
  0x2b   : > { %s773_s16 = scalar_lea.vmem %s772_s14, 256  ;;  %p774_p6 = scmp.lt.s32.totalorder %s1017_s26, %s772_s14 }
  0x2c   : > { %v312_v8 = vpack.c.bf16 %v309_v3, %v309_v3  ;;  %v356_v9 = vsel %vm354_vm0, %v311_v4, 0  ;;  %324 = vperm.xlu0 %718, %v304_v22   ;;  %334 = vperm.xlu1 %719, %v306_v23   ;;  %p775_p7 = scmp.lt.s32.totalorder %s773_s16, %s767_s12 }
  0x2e   : > { %642 = vmatprep.subr.msk.bf16.mxu0 %vm354_vm0, %v312_v8  ;;  %p776_p8 = por %p775_p7, %p774_p6 }
  0x2f   : > { %362 = vmatpush1.bf16.msra.mxu0 %v356_v9 }
  0x30   : > { %486 = vperm.xlu0 %718, %v483_v25   ;;  %p777_p10 = pnand %p776_p8, %p770_p5 }
  0x32   : > { %643 = vmatmul.mubr.msk.bf16.vlgmr.msra.gmra.mrb[0].mxu0 %vm347_vm1, %v721_v17 }
  0x33   : > { %403 = vmatprep.mubr.bf16.mxu0 %v850_v0 }
  0x3a   : > { %644 = vmatmul.mubr.msk.bf16.gmra.mrb[4].mxu0 %vm347_vm1, %v722_v24 }
  0xa7   : > { %v320_v26 = vpop.permute.xlu0 %319  ;;  %v330_v37 = vpop.permute.xlu1 %329 }
  0xab   : > { %v325_v30 = vpop.permute.xlu0 %324  ;;  %v335_v48 = vpop.permute.xlu1 %334 }
 0x105   : > { %v395_v27 = vpop.f32.mrb[0].mxu0 }
 0x106   : > { %v991_v28 = vadd.f32 %v395_v27, %v320_v26  ;;  %v397_v29 = vpop.f32.mrb[1].mxu0 }
 0x107   : > { %v993_v31 = vadd.f32 %v397_v29, %v320_v26  ;;  %v399_v32 = vpop.f32.mrb[2].mxu0 }
 0x108   : > { %v645_v33 = vmul.f32 -1.702, %v991_v28  ;;  %v996_v34 = vadd.f32 %v399_v32, %v325_v30  ;;  %v401_v35 = vpop.f32.mrb[3].mxu0 }
 0x109   : > { %v646_v36 = vmul.f32 -1.702, %v993_v31  ;;  %v999_v38 = vadd.f32 %v401_v35, %v325_v30  ;;  %v487_v35 = vpop.permute.xlu0 %486 }
 0x10a   : > { %v430_v39 = vmul.f32 1.442695, %v645_v33  ;;  %v647_v40 = vmul.f32 -1.702, %v996_v34 }
 0x10b   : > { %v432_v41 = vmul.f32 1.442695, %v646_v36  ;;  %v648_v42 = vmul.f32 -1.702, %v999_v38 }
 0x10c   : > { %723 = vpow2.f32 %v430_v39  ;;  %v434_v43 = vmul.f32 1.442695, %v647_v40 }
 0x10d   : > { %725 = vpow2.f32 %v432_v41  ;;  %v436_v44 = vmul.f32 1.442695, %v648_v42  ;;  %v405_v45 = vpop.f32.mrb[4].mxu0 }
 0x10e   : > { %727 = vpow2.f32 %v434_v43  ;;  %v406_v46 = vadd.f32 %v405_v45, %v330_v37  ;;  %v407_v47 = vpop.f32.mrb[5].mxu0 }
 0x10f   : > { %729 = vpow2.f32 %v436_v44  ;;  %v408_v49 = vadd.f32 %v407_v47, %v330_v37  ;;  %v409_v50 = vpop.f32.mrb[6].mxu0 }
 0x110   : > { %v649_v51 = vmul.f32 -1.702, %v406_v46  ;;  %v410_v52 = vadd.f32 %v409_v50, %v335_v48  ;;  %v411_v53 = vpop.f32.mrb[7].mxu0 }
 0x111   : > { %v650_v54 = vmul.f32 -1.702, %v408_v49  ;;  %v412_v55 = vadd.f32 %v411_v53, %v335_v48 }
 0x112   : > { %v438_v56 = vmul.f32 1.442695, %v649_v51  ;;  %v651_v57 = vmul.f32 -1.702, %v410_v52 }
 0x113   : > { %v440_v58 = vmul.f32 1.442695, %v650_v54  ;;  %v652_v59 = vmul.f32 -1.702, %v412_v55 }
 0x114   : > { %731 = vpow2.f32 %v438_v56  ;;  %v442_v60 = vmul.f32 1.442695, %v651_v57 }
 0x115   : > { %733 = vpow2.f32 %v440_v58  ;;  %v444_v61 = vmul.f32 1.442695, %v652_v59 }
 0x116   : > { %v724_v62 = vpop.eup %723  ;;  %735 = vpow2.f32 %v442_v60 }
 0x117   : > { %v726_v63 = vpop.eup %725  ;;  %v446_v0 = vadd.f32 1.0, %v724_v62  ;;  %737 = vpow2.f32 %v444_v61 }
 0x118   : > { %v728_v1 = vpop.eup %727  ;;  %v447_v2 = vadd.f32 1.0, %v726_v63 }
 0x119   : > { %v730_v3 = vpop.eup %729  ;;  %739 = vrcp.f32 %v446_v0  ;;  %v448_v4 = vadd.f32 1.0, %v728_v1 }
 0x11a   : > { %741 = vrcp.f32 %v447_v2  ;;  %v449_v5 = vadd.f32 1.0, %v730_v3 }
 0x11b   : > { %743 = vrcp.f32 %v448_v4 }
 0x11c   : > { %745 = vrcp.f32 %v449_v5 }
 0x11e   : > { %v732_v6 = vpop.eup %731 }
 0x11f   : > { %v734_v7 = vpop.eup %733  ;;  %v450_v8 = vadd.f32 1.0, %v732_v6 }
 0x120   : > { %v736_v9 = vpop.eup %735  ;;  %v451_v10 = vadd.f32 1.0, %v734_v7 }
 0x121   : > { %v738_v11 = vpop.eup %737  ;;  %747 = vrcp.f32 %v450_v8  ;;  %v452_v12 = vadd.f32 1.0, %v736_v9 }
 0x122   : > { %749 = vrcp.f32 %v451_v10  ;;  %v453_v13 = vadd.f32 1.0, %v738_v11 }
 0x123   : > { %v740_v14 = vpop.eup %739  ;;  %751 = vrcp.f32 %v452_v12 }
 0x124   : > { %v742_v15 = vpop.eup %741  ;;  %753 = vrcp.f32 %v453_v13  ;;  %v470_v18 = vmul.f32 %v740_v14, %v991_v28 }
 0x125   : > { %v744_v16 = vpop.eup %743  ;;  %v471_v20 = vmul.f32 %v742_v15, %v993_v31  ;;  %v478_v31 = vld [vmem:[%s1067_s5] sm:$0x3] }
 0x126   : > { %v746_v17 = vpop.eup %745  ;;  %v472_v19 = vmul.f32 %v744_v16, %v996_v34 }
 0x127   : > { %v473_v21 = vmul.f32 %v746_v17, %v999_v38 }
 0x128   : > { %v479_v22 = vpack.c.bf16 %v472_v19, %v470_v18 }
 0x129   : > { %v480_v23 = vpack.c.bf16 %v473_v21, %v471_v20 }
 0x12b   : > { %v748_v24 = vpop.eup %747  ;;  %493 = vmatprep.subr.bf16.mxu1 %v480_v23 }
 0x12c   : > { %v750_v25 = vpop.eup %749  ;;  %494 = vmatpush1.bf16.msra.mxu1 %v479_v22  ;;  %v474_v29 = vmul.f32 %v748_v24, %v406_v46 }
 0x12d   : > { %v752_v26 = vpop.eup %751  ;;  %v475_v32 = vmul.f32 %v750_v25, %v408_v49 }
 0x12e   : > { %v754_v27 = vpop.eup %753  ;;  %v476_v30 = vmul.f32 %v752_v26, %v410_v52 }
 0x12f   : > { %v477_v28 = vmul.f32 %v754_v27, %v412_v55 }
 0x130   : > { %v481_v33 = vpack.c.bf16 %v476_v30, %v474_v29 }
 0x131   : > { %v482_v34 = vpack.c.bf16 %v477_v28, %v475_v32 }
 0x133   : > { %495 = vmatprep.subr.bf16.mxu1 %v482_v34 }
 0x134   : > { %496 = vmatpush1.bf16.msra.mxu1 %v481_v33 }
 0x137   : > { %653 = vmatmul.mubr.msk.bf16.vlgmr.msra.gmra.mrb[0].mxu1 %vm489_vm2, %v478_v31 }
 0x20a   : > { %v527_v36 = vpop.f32.mrb[0].mxu1 }
 0x20b   : > { %v528_v37 = vadd.f32 %v527_v36, %v487_v35  ;;  %v529_v38 = vpop.f32.mrb[1].mxu1 }
 0x20c   : > { %v530_v39 = vadd.f32 %v529_v38, %v487_v35  ;;  %v531_v40 = vpop.f32.mrb[2].mxu1 }
 0x20d   : > { %v532_v41 = vpop.f32.mrb[3].mxu1 }
 0x20e   : > { %v536_v42 = vcombine.low %v528_v37, %v530_v39 }
 0x210   : > { %538 = vst [vmem:[%s276_s25] sm:$0xff] %v536_v42 }
 0x211   : > { %780 = shalt.err (!%p777_p10)
}
 0x212   : > { %s781_s19 = scalar_lea.hbm %s1015_s20, 128  ;;  %s785_s23 = scalar_lea.hbm %s1069_s7, 256 }
 0x213   : > { %p782_p11 = scmp.ne.s32.totalorder %s1015_s20, %s781_s19  ;;  %p786_p1 = scmp.lt.u32.totalorder %s1015_s20, %s1069_s7 }
 0x214   : > { %p787_p2 = scmp.lt.u32.totalorder %s785_s23, %s781_s19  ;;  %p789_p4 = scmp.lt.u32.totalorder %s781_s19, %s1015_s20 }
 0x215   : > { %p783_p12 = pnand %p782_p11, %p935_p9 }
 0x216   : > { %p788_p3 = por %p787_p2, %p786_p1 }
 0x217   : > { %p784_p0 = pneg %p783_p12 }
 0x218   : > { %p790_p5 = por %p789_p4, %p788_p3 }
 0x21a   : > { %p791_p6 = pnand %p790_p5, %p784_p0 }
 0x21c   : > { %794 = shalt.err (!%p791_p6)
}
 0x21d   : > { %661 = dma.vmem_to_hbm [thread:$0]  (%p935_p9), %s1017_s26, 128, %s1015_s20, %s540_s11  }
 0x21e PF: > { %p667_p7 = scmp.ge.s32.totalorder %s847_s10, 2  ;;  %s568_s27 = sand.u32 1, %s827_s29  }
 0x21f   : > { %s569_s28 = scalar_lea.sflag [#allocation5], %s568_s27 }
 0x220   : > { %p664_p8 = pnand %p667_p7, %p942_p13 }
 0x222   : > { %822 = dma.done.wait (!%p664_p8), %s569_s28, 128  }
 0x223   : > { %824 = vsyncadd (!%p664_p8), %s569_s28, 4294967168  ;;  %s26_s10 = sadd.s32 1, %s847_s10   ;;  %s1072_s29 = smov %s831_s30 }
 0x224   : > { %p23_p10 = scmp.ge.s32.totalorder %s26_s10, 4   ;;  %s1073_s30 = smov %s835_s0 }
 0x225   : > { %s1074_s0 = smov %s948_s18  ;;  %s1075_s8 = smov %s843_s9 }
 0x226   : > { %s1076_s9 = smov %s1078_s13  ;;  %25 = sbr.rel (!%p23_p10) target bundleno = 19 (0x13), region = 79 }
 0x22d   :  { %574 = vsyncpa [#allocation5], 1 }
 0x22e   :  { %576 = vsyncpa [#allocation5 + $0x1], 1 }

</bundles_post_ra>
